<compile_context>
chip_gen: v7x
topology: tpu7x:2x2x1
jax: 0.10.0
libtpu: 0.0.40
codegen_flags: <defaults>
</compile_context>

<pallas_src>
import functools

import jax
import jax.numpy as jnp
from jax.experimental import pallas as pl
from jax.experimental.pallas import tpu as pltpu

LANES = 128
SUBLANES = 8
MAX_BLOCK_ROWS = 4096      # (4096, 128) f32 = 2 MiB per input per pipeline buffer
CHUNK_TARGET_ROWS = 512    # streaming sub-chunk inside a block


def _cdiv(a, b):
    return -(-a // b)


def _round_up(a, m):
    return _cdiv(a, m) * m


def _detect_num_tensorcores():
    """Best-effort TensorCores-per-chip (2 on megacore parts, else 1)."""
    try:
        info = pltpu.get_tpu_info()
        for name in ("num_cores", "num_tensorcores", "tensorcore_count",
                     "cores_per_chip", "core_count"):
            v = getattr(info, name, None)
            if v is not None:
                v = int(v)
                if v >= 1:
                    return min(v, 8)
    except Exception:
        pass
    return 1


def _dice_kernel(x_ref, t_ref, acc_ref, *, rows, block_rows, blocks_per_core,
                 chunk_rows, mask_rows):
    c = pl.program_id(0)   # TensorCore split ("parallel"; size 1 on 1-TC chips)
    j = pl.program_id(1)   # reduction steps ("arbitrary")

    @pl.when(j == 0)
    def _():
        acc_ref[...] = jnp.zeros_like(acc_ref)

    # Virtual (unclamped) base row of this block in the flattened (rows,128) slab.
    base = (c * blocks_per_core + j) * block_rows
    n_chunks = block_rows // chunk_rows
    rem_rows = block_rows - n_chunks * chunk_rows

    def chunk_partials(start, nrows, masked):
        x = x_ref[pl.ds(start, nrows), :].astype(jnp.float32)
        t = t_ref[pl.ds(start, nrows), :].astype(jnp.float32)
        s = jax.nn.sigmoid(x)
        if masked:
            # Row mask built from a (nrows, 1) iota; broadcast over lanes.
            row = jax.lax.broadcasted_iota(jnp.int32, (nrows, 1), 0)
            valid = (base + start + row) < rows
            s = jnp.where(valid, s, 0.0)
            t = jnp.where(valid, t, 0.0)
        p = (s * t).reshape(-1, SUBLANES, LANES)
        b = (s + t).reshape(-1, SUBLANES, LANES)
        return jnp.sum(p, axis=0), jnp.sum(b, axis=0)

    def accumulate_block(masked):
        zero = jnp.zeros((SUBLANES, LANES), jnp.float32)

        def body(i, carry):
            ap, ab = carry
            start = pl.multiple_of(i * chunk_rows, SUBLANES)
            pp, bb = chunk_partials(start, chunk_rows, masked)
            return ap + pp, ab + bb

        ap, ab = jax.lax.fori_loop(0, n_chunks, body, (zero, zero), unroll=True)
        if rem_rows:
            pp, bb = chunk_partials(n_chunks * chunk_rows, rem_rows, masked)
            ap = ap + pp
            ab = ab + bb
        # Vreg-shaped VMEM accumulator; single read-modify-write per block.
        acc_ref[0, 0] += ap
        acc_ref[0, 1] += ab

    if mask_rows:
        # Only edge / phantom blocks pay for the masking ops.
        is_edge = base + block_rows > rows

        @pl.when(jnp.logical_not(is_edge))
        def _():
            accumulate_block(False)

        @pl.when(is_edge)
        def _():
            accumulate_block(True)
    else:
        accumulate_block(False)


def dice_loss(inputs, targets, smooth=1.0, num_cores=None):
    """Pallas DiceLoss forward.  inputs/targets: any matching shape (e.g. NCHW)."""
    assert inputs.shape == targets.shape
    smooth = float(smooth)
    n = int(inputs.size)

    x_flat = inputs.reshape(-1)
    t_flat = targets.reshape(-1)

    chunk = SUBLANES * LANES  # 1024 elements
    n_bulk = (n // chunk) * chunk
    n_tail = n - n_bulk

    # <1024-element ragged tail: plain jnp, avoids any padding copy of the bulk.
    if n_tail:
        xt = x_flat[n_bulk:].astype(jnp.float32)
        tt = t_flat[n_bulk:].astype(jnp.float32)
        st = jax.nn.sigmoid(xt)
        inter_tail = jnp.sum(st * tt)
        denom_tail = jnp.sum(st + tt)
    else:
        inter_tail = jnp.float32(0.0)
        denom_tail = jnp.float32(0.0)

    if n_bulk == 0:
        # Degenerate tiny input (< 1024 elements): nothing left for the kernel.
        return (2.0 * inter_tail + smooth) / (denom_tail + smooth)

    rows = n_bulk // LANES                       # multiple of 8
    x2 = x_flat[:n_bulk].reshape(rows, LANES)    # free reshape of contiguous data
    t2 = t_flat[:n_bulk].reshape(rows, LANES)

    # ---- chip-aware grid -------------------------------------------------
    if num_cores is None:
        num_cores = _detect_num_tensorcores()
    num_cores = max(1, int(num_cores))
    if rows < num_cores * SUBLANES:
        num_cores = 1                            # too small to split usefully

    rows_per_core = _round_up(_cdiv(rows, num_cores), SUBLANES)
    block_rows = min(MAX_BLOCK_ROWS, rows_per_core)
    blocks_per_core = _cdiv(rows_per_core, block_rows)
    num_real_blocks = _cdiv(rows, block_rows)    # blocks that actually exist in x2
    covered_rows = num_cores * blocks_per_core * block_rows
    mask_rows = covered_rows != rows             # some block has invalid rows
    clamp_blocks = num_cores * blocks_per_core > num_real_blocks  # phantom blocks
    chunk_rows = min(CHUNK_TARGET_ROWS, block_rows)

    kernel = functools.partial(
        _dice_kernel,
        rows=rows,
        block_rows=block_rows,
        blocks_per_core=blocks_per_core,
        chunk_rows=chunk_rows,
        mask_rows=mask_rows,
    )

    def in_map(c, j):
        b = c * blocks_per_core + j
        if clamp_blocks:
            # Entirely-phantom blocks re-read the last real block; their rows
            # are masked to zero inside the kernel.
            b = jnp.minimum(b, num_real_blocks - 1)
        return (b, 0)

    bytes_in = n_bulk * (x2.dtype.itemsize + t2.dtype.itemsize)
    cost = pl.CostEstimate(
        flops=5 * n_bulk,
        transcendentals=n_bulk,  # one exp per sigmoid
        bytes_accessed=int(bytes_in) + num_cores * 2 * SUBLANES * LANES * 4,
    )

    acc = pl.pallas_call(
        kernel,
        out_shape=jax.ShapeDtypeStruct((num_cores, 2, SUBLANES, LANES), jnp.float32),
        grid_spec=pltpu.PrefetchScalarGridSpec(
            num_scalar_prefetch=0,
            grid=(num_cores, blocks_per_core),
            in_specs=[
                pl.BlockSpec((block_rows, LANES), in_map),
                pl.BlockSpec((block_rows, LANES), in_map),
            ],
            out_specs=pl.BlockSpec((1, 2, SUBLANES, LANES),
                                   lambda c, j: (c, 0, 0, 0)),
        ),
        compiler_params=pltpu.CompilerParams(
            dimension_semantics=("parallel", "arbitrary"),
            vmem_limit_bytes=32 * 1024 * 1024,
        ),
        cost_estimate=cost,
    )(x2, t2)

    # Single cross-lane reduce + divide, once, in the wrapper.
    inter = jnp.sum(acc[:, 0]) + inter_tail
    denom = jnp.sum(acc[:, 1]) + denom_tail
    return (2.0 * inter + smooth) / (denom + smooth)


def dice_loss_ref(inputs, targets, smooth=1.0):
    s = jax.nn.sigmoid(inputs.astype(jnp.float32)).reshape(-1)
    t = targets.astype(jnp.float32).reshape(-1)
    inter = jnp.sum(s * t)
    return (2.0 * inter + smooth) / (jnp.sum(s) + jnp.sum(t) + smooth)


if __name__ == "__main__":
    key = jax.random.PRNGKey(0)
    ks = jax.random.split(key, 8)

    # Primary demo: small NCHW logits + binary segmentation-style mask.
    x = jax.random.normal(ks[0], (2, 4, 16, 16), dtype=jnp.float32)
    tgt = (jax.random.uniform(ks[1], (2, 4, 16, 16)) > 0.5).astype(jnp.float32)
    out = jax.block_until_ready(dice_loss(x, tgt, smooth=1.0))
    ref = jax.block_until_ready(dice_loss_ref(x, tgt, smooth=1.0))
    assert jnp.allclose(out, ref, atol=1e-5, rtol=1e-5), (out, ref)

    # Ragged shape: exercises the edge-mask path + <1024-element jnp tail.
    xr = jax.random.normal(ks[2], (3, 5, 17, 13), dtype=jnp.float32)
    tr = (jax.random.uniform(ks[3], (3, 5, 17, 13)) > 0.5).astype(jnp.float32)
    out_r = jax.block_until_ready(dice_loss(xr, tr, smooth=1.0))
    ref_r = jax.block_until_ready(dice_loss_ref(xr, tr, smooth=1.0))
    assert jnp.allclose(out_r, ref_r, atol=1e-5, rtol=1e-5), (out_r, ref_r)

    # Non-multiple-of-chunk block: exercises the leftover-chunk streaming path.
    xc = jax.random.normal(ks[4], (2, 4, 100, 100), dtype=jnp.float32)
    tc = (jax.random.uniform(ks[5], (2, 4, 100, 100)) > 0.5).astype(jnp.float32)
    out_c = jax.block_until_ready(dice_loss(xc, tc, smooth=1.0))
    ref_c = jax.block_until_ready(dice_loss_ref(xc, tc, smooth=1.0))
    assert jnp.allclose(out_c, ref_c, atol=1e-5, rtol=1e-5), (out_c, ref_c)

    # Multi-block shape: >1 reduction step, interior (unmasked) + edge blocks.
    xm = jax.random.normal(ks[6], (4, 4, 320, 320), dtype=jnp.float32)
    tm = (jax.random.uniform(ks[7], (4, 4, 320, 320)) > 0.5).astype(jnp.float32)
    out_m = jax.block_until_ready(dice_loss(xm, tm, smooth=1.0))
    ref_m = jax.block_until_ready(dice_loss_ref(xm, tm, smooth=1.0))
    assert jnp.allclose(out_m, ref_m, atol=1e-5, rtol=1e-4), (out_m, ref_m)

    print("KERNEL_OK")
</pallas_src>

<mosaic_0001>
module attributes {stable_mosaic.version = 11 : i64} {
  func.func @_dice_kernel(%arg0: i32, %arg1: i32, %arg2: memref<16x128xf32, #tpu.memory_space<vmem>>, %arg3: memref<16x128xf32, #tpu.memory_space<vmem>>, %arg4: memref<1x2x8x128xf32, #tpu.memory_space<vmem>>) attributes {dimension_semantics = [#tpu.dimension_semantics<parallel>, #tpu.dimension_semantics<arbitrary>], iteration_bounds = array<i64: 1, 1>, scalar_prefetch = 0 : i64, scratch_operands = 0 : i64, tpu.core_type = #tpu.core_type<tc>, window_params = [{transform_indices = @transform_0, window_bounds = array<i64: 16, 128>}, {transform_indices = @transform_1, window_bounds = array<i64: 16, 128>}, {transform_indices = @transform_2, window_bounds = array<i64: 1, 2, 8, 128>}]} {
    %c0_i32 = arith.constant 0 : i32
    %0 = arith.cmpi eq, %arg1, %c0_i32 : i32
    %1 = arith.extui %0 : i1 to i32
    %c0_i32_0 = arith.constant 0 : i32
    %2 = arith.cmpi ne, %1, %c0_i32_0 : i32
    scf.if %2 {
      %cst_21 = arith.constant 0.000000e+00 : f32
      %35 = vector.broadcast %cst_21 : f32 to vector<1x2x8x128xf32>
      %c0_22 = arith.constant 0 : index
      %c0_23 = arith.constant 0 : index
      %c0_24 = arith.constant 0 : index
      %c0_25 = arith.constant 0 : index
      %36 = vector.load %arg4[%c0_22, %c0_23, %c0_24, %c0_25] : memref<1x2x8x128xf32, #tpu.memory_space<vmem>>, vector<1x2x8x128xf32>
      tpu.vector_store %arg4[%c0_22, %c0_23, %c0_24, %c0_25], %35 {strides = array<i32>} : memref<1x2x8x128xf32, #tpu.memory_space<vmem>>, vector<1x2x8x128xf32>,
    } else {
    }
    %cst = arith.constant 0.000000e+00 : f32
    %3 = vector.broadcast %cst : f32 to vector<8x128xf32>
    %c0_i32_1 = arith.constant 0 : i32
    %c16_i32 = arith.constant 16 : i32
    %4 = arith.muli %c0_i32_1, %c16_i32 : i32
    %5 = tpu.assume_multiple %4, 8 : i32
    %6 = arith.index_cast %5 : i32 to index
    %c0 = arith.constant 0 : index
    %7 = vector.load %arg2[%6, %c0] : memref<16x128xf32, #tpu.memory_space<vmem>>, vector<16x128xf32>
    %8 = arith.index_cast %5 : i32 to index
    %c0_2 = arith.constant 0 : index
    %9 = vector.load %arg3[%8, %c0_2] : memref<16x128xf32, #tpu.memory_space<vmem>>, vector<16x128xf32>
    %10 = arith.negf %7 : vector<16x128xf32>
    %11 = math.exp %10 : vector<16x128xf32>
    %cst_3 = arith.constant 1.000000e+00 : f32
    %12 = vector.broadcast %cst_3 : f32 to vector<16x128xf32>
    %13 = arith.addf %12, %11 : vector<16x128xf32>
    %14 = arith.divf %12, %13 : vector<16x128xf32>
    %15 = arith.mulf %14, %9 : vector<16x128xf32>
    %16 = vector.shape_cast %15 : vector<16x128xf32> to vector<2x8x128xf32>
    %17 = arith.addf %14, %9 : vector<16x128xf32>
    %18 = vector.shape_cast %17 : vector<16x128xf32> to vector<2x8x128xf32>
    %cst_4 = arith.constant dense<0.000000e+00> : vector<8x128xf32>
    %19 = vector.multi_reduction <add>, %16, %cst_4 [0] : vector<2x8x128xf32> to vector<8x128xf32>
    %cst_5 = arith.constant dense<0.000000e+00> : vector<8x128xf32>
    %20 = vector.multi_reduction <add>, %18, %cst_5 [0] : vector<2x8x128xf32> to vector<8x128xf32>
    %21 = arith.addf %3, %19 : vector<8x128xf32>
    %22 = arith.addf %3, %20 : vector<8x128xf32>
    %c1_i32 = arith.constant 1 : i32
    %c0_6 = arith.constant 0 : index
    %c0_7 = arith.constant 0 : index
    %c0_8 = arith.constant 0 : index
    %c0_9 = arith.constant 0 : index
    %23 = vector.load %arg4[%c0_6, %c0_7, %c0_8, %c0_9] : memref<1x2x8x128xf32, #tpu.memory_space<vmem>>, vector<1x1x8x128xf32>
    %24 = vector.shape_cast %23 : vector<1x1x8x128xf32> to vector<8x128xf32>
    %25 = arith.addf %24, %21 : vector<8x128xf32>
    %c0_10 = arith.constant 0 : index
    %c0_11 = arith.constant 0 : index
    %c0_12 = arith.constant 0 : index
    %c0_13 = arith.constant 0 : index
    %26 = vector.load %arg4[%c0_10, %c0_11, %c0_12, %c0_13] : memref<1x2x8x128xf32, #tpu.memory_space<vmem>>, vector<1x1x8x128xf32>
    %27 = vector.shape_cast %26 : vector<1x1x8x128xf32> to vector<8x128xf32>
    %28 = vector.shape_cast %25 : vector<8x128xf32> to vector<1x1x8x128xf32>
    tpu.vector_store %arg4[%c0_10, %c0_11, %c0_12, %c0_13], %28 {strides = array<i32>} : memref<1x2x8x128xf32, #tpu.memory_space<vmem>>, vector<1x1x8x128xf32>,
    %c0_14 = arith.constant 0 : index
    %c1 = arith.constant 1 : index
    %c0_15 = arith.constant 0 : index
    %c0_16 = arith.constant 0 : index
    %29 = vector.load %arg4[%c0_14, %c1, %c0_15, %c0_16] : memref<1x2x8x128xf32, #tpu.memory_space<vmem>>, vector<1x1x8x128xf32>
    %30 = vector.shape_cast %29 : vector<1x1x8x128xf32> to vector<8x128xf32>
    %31 = arith.addf %30, %22 : vector<8x128xf32>
    %c0_17 = arith.constant 0 : index
    %c1_18 = arith.constant 1 : index
    %c0_19 = arith.constant 0 : index
    %c0_20 = arith.constant 0 : index
    %32 = vector.load %arg4[%c0_17, %c1_18, %c0_19, %c0_20] : memref<1x2x8x128xf32, #tpu.memory_space<vmem>>, vector<1x1x8x128xf32>
    %33 = vector.shape_cast %32 : vector<1x1x8x128xf32> to vector<8x128xf32>
    %34 = vector.shape_cast %31 : vector<8x128xf32> to vector<1x1x8x128xf32>
    tpu.vector_store %arg4[%c0_17, %c1_18, %c0_19, %c0_20], %34 {strides = array<i32>} : memref<1x2x8x128xf32, #tpu.memory_space<vmem>>, vector<1x1x8x128xf32>,
    return
  }
  func.func @transform_0(%arg0: i32, %arg1: i32) -> (i32, i32) {
    %c1_i32 = arith.constant 1 : i32
    %0 = arith.muli %arg0, %c1_i32 : i32
    %1 = arith.addi %0, %arg1 : i32
    %c0_i32 = arith.constant 0 : i32
    %c0_i32_0 = arith.constant 0 : i32
    return %1, %c0_i32 : i32, i32
  }
  func.func @transform_1(%arg0: i32, %arg1: i32) -> (i32, i32) {
    %c1_i32 = arith.constant 1 : i32
    %0 = arith.muli %arg0, %c1_i32 : i32
    %1 = arith.addi %0, %arg1 : i32
    %c0_i32 = arith.constant 0 : i32
    %c0_i32_0 = arith.constant 0 : i32
    return %1, %c0_i32 : i32, i32
  }
  func.func @transform_2(%arg0: i32, %arg1: i32) -> (i32, i32, i32, i32) {
    %c0_i32 = arith.constant 0 : i32
    %c0_i32_0 = arith.constant 0 : i32
    %c0_i32_1 = arith.constant 0 : i32
    %c0_i32_2 = arith.constant 0 : i32
    return %arg0, %c0_i32, %c0_i32_0, %c0_i32_1 : i32, i32, i32, i32
  }
}

</mosaic_0001>

<bundles_post_ra>
// kernel: tpu_custom_call.1
= control target key start
LH: loop header
LB: loop body
LE: loop exit
PB: predicated region body
PF: predicated region fallthrough
CT: control target
= control target key end

     0   :  { %7 = vsyncpa [#allocation3], 0  ;;  %s260_s0 = inlined_call_operand.hbm [shape: f32[16,128], index: 0, kind: input, shape index: {}]   ;;  %s261_s1 = inlined_call_operand.hbm [shape: f32[16,128], index: 1, kind: input, shape index: {}]   ;;  %s262_s2 = inlined_call_operand.hbm [shape: f32[1,2,8,128], index: 2, kind: output, shape index: {}]  }
   0x1   :  { %8 = vsyncpa [#allocation6], 0 }
   0x2   :  { %9 = vsyncpa [#allocation4], 0  ;;  %s195_s9 = smov [#allocation2]   ;;  %s123_s13 = scalar_lea.hbm %s260_s0, 256 }
   0x3   :  { %s19_s10 = sshll.u32 %s195_s9, 4  ;;  %p124_p0 = scmp.ne.s32.totalorder %s260_s0, %s123_s13  ;;  %s20_s10 = int_to_ptr.vmem [resolvable:$true] %s19_s10 }
   0x4   :  { %p127_p1 = scmp.lt.u32.totalorder %s123_s13, %s260_s0 }
   0x6   :  { %p129_p2 = pnand %p127_p1, %p124_p0 }
   0x8   :  { %132 = shalt.err (!%p129_p2)
}
   0x9   :  { %s133_s18 = scalar_lea.vmem %s20_s10, 256  ;;  %p138_p4 = scmp.lt.s32.totalorder %s20_s10, %s20_s10 }
   0xa   :  { %p134_p3 = scmp.ne.s32.totalorder %s20_s10, %s133_s18  ;;  %p139_p5 = scmp.lt.s32.totalorder %s133_s18, %s133_s18 }
   0xc   :  { %p140_p6 = por %p139_p5, %p138_p4 }
   0xe   :  { %p141_p7 = pnand %p140_p6, %p134_p3 }
  0x10   :  { %144 = shalt.err (!%p141_p7)
}
  0x11   :  { %s196_s19 = smov 128   ;;  %s197_s20 = smov 8  }
  0x12   :  { %25 = dma.hbm_to_vmem [thread:$0]  %s260_s0, 256, %s20_s10, [#allocation3], %s196_s19, %s196_s19, %s197_s20  }
  0x13   :  { %s198_s23 = smov [#allocation5]   ;;  %s145_s27 = scalar_lea.hbm %s261_s1, 256 }
  0x14   :  { %s35_s24 = sshll.u32 %s198_s23, 4  ;;  %p146_p8 = scmp.ne.s32.totalorder %s261_s1, %s145_s27  ;;  %s36_s24 = int_to_ptr.vmem [resolvable:$true] %s35_s24 }
  0x15   :  { %p149_p9 = scmp.lt.u32.totalorder %s145_s27, %s261_s1 }
  0x17   :  { %p151_p10 = pnand %p149_p9, %p146_p8 }
  0x19   :  { %154 = shalt.err (!%p151_p10)
}
  0x1a   :  { %s155_s4 = scalar_lea.vmem %s36_s24, 256  ;;  %p160_p12 = scmp.lt.s32.totalorder %s36_s24, %s36_s24 }
  0x1b   :  { %p156_p11 = scmp.ne.s32.totalorder %s36_s24, %s155_s4  ;;  %p161_p13 = scmp.lt.s32.totalorder %s155_s4, %s155_s4 }
  0x1d   :  { %p162_p0 = por %p161_p13, %p160_p12 }
  0x1f   :  { %p163_p1 = pnand %p162_p0, %p156_p11 }
  0x21   :  { %166 = shalt.err (!%p163_p1)
}
  0x22   :  { %41 = dma.hbm_to_vmem [thread:$0]  %s261_s1, 256, %s36_s24, [#allocation6], %s196_s19, %s196_s19, %s197_s20  }
  0x23   :  { %189 = dma.done.wait [#allocation3], 256  }
  0x24   :  { %190 = vsyncadd [#allocation3], 4294967040 }
  0x25   :  { %191 = dma.done.wait [#allocation6], 256  }
  0x26   :  { %192 = vsyncadd [#allocation6], 4294967040  ;;  %v58_v0 = vld [vmem:[#allocation2] sm:$0xff]  ;;  %v59_v1 = vld [vmem:[#allocation2 + $0x8] sm:$0xff]  ;;  %s199_s1 = smov [#allocation7]  }
  0x27   :  { %v107_v2 = vmul.f32 -1.442695, %v58_v0  ;;  %v108_v3 = vmul.f32 -1.442695, %v59_v1  ;;  %v60_v8 = vld [vmem:[#allocation5] sm:$0xff]  ;;  %v61_v9 = vld [vmem:[#allocation5 + $0x8] sm:$0xff] }
  0x28   :  { %s94_s6 = sshll.u32 %s199_s1, 4  ;;  %s95_s6 = int_to_ptr.vmem [resolvable:$true] %s94_s6 }
  0x29   :  { %115 = vpow2.f32 %v107_v2  ;;  %s167_s7 = scalar_lea.vmem %s95_s6, 256  ;;  %p172_p3 = scmp.lt.s32.totalorder %s95_s6, %s95_s6 }
  0x2a   :  { %117 = vpow2.f32 %v108_v3  ;;  %p168_p2 = scmp.ne.s32.totalorder %s95_s6, %s167_s7  ;;  %p173_p4 = scmp.lt.s32.totalorder %s167_s7, %s167_s7 }
  0x2c   :  { %p174_p5 = por %p173_p4, %p172_p3 }
  0x2e   :  { %p175_p6 = pnand %p174_p5, %p168_p2 }
  0x33   :  { %v116_v4 = vpop.eup %115 }
  0x34   :  { %v118_v5 = vpop.eup %117  ;;  %v68_v6 = vadd.f32 1.0, %v116_v4 }
  0x35   :  { %v69_v7 = vadd.f32 1.0, %v118_v5 }
  0x36   :  { %119 = vrcp.f32 %v68_v6 }
  0x37   :  { %121 = vrcp.f32 %v69_v7 }
  0x40   :  { %v120_v10 = vpop.eup %119 }
  0x41   :  { %v122_v11 = vpop.eup %121  ;;  %v74_v12 = vmul.f32 %v120_v10, %v60_v8  ;;  %v76_v13 = vadd.f32 %v120_v10, %v60_v8 }
  0x42   :  { %v75_v14 = vmul.f32 %v122_v11, %v61_v9  ;;  %v77_v15 = vadd.f32 %v122_v11, %v61_v9 }
  0x44   :  { %v78_v16 = vadd.f32 %v75_v14, %v74_v12  ;;  %v79_v17 = vadd.f32 %v77_v15, %v76_v13 }
  0x46   :  { %84 = vst [vmem:[#allocation7] sm:$0xff] %v78_v16  ;;  %88 = vst [vmem:[#allocation7 + $0x8] sm:$0xff] %v79_v17 }
  0x47   :  { %178 = shalt.err (!%p175_p6)
}
  0x48   :  { %s179_s10 = scalar_lea.hbm %s262_s2, 256 }
  0x49   :  { %p180_p7 = scmp.ne.s32.totalorder %s262_s2, %s179_s10  ;;  %p183_p8 = scmp.lt.u32.totalorder %s179_s10, %s262_s2 }
  0x4b   :  { %p185_p9 = pnand %p183_p8, %p180_p7 }
  0x4d   :  { %188 = shalt.err (!%p185_p9)
}
  0x4e   :  { %100 = dma.vmem_to_hbm [thread:$0]  %s95_s6, 256, %s262_s2, [#allocation4], %s196_s19, %s196_s19, %s197_s20  }
  0x4f   :  { %193 = dma.done.wait [#allocation4], 256  }
  0x50   :  { %194 = vsyncadd [#allocation4], 4294967040 }
  0x51   :  { %104 = vsyncpa [#allocation3], 1 }
  0x52   :  { %105 = vsyncpa [#allocation6], 1 }
  0x53   :  { %106 = vsyncpa [#allocation4], 1 }

</bundles_post_ra>
